<compile_context>
chip_gen: v5e
topology: v5e:2x2
jax: 0.10.0
libtpu: 0.0.40
codegen_flags: <defaults>
</compile_context>

<pallas_src>
import functools

import jax
import jax.numpy as jnp
from jax.experimental import pallas as pl
from jax.experimental.pallas import tpu as pltpu


def _round_up(x, m):
    return ((x + m - 1) // m) * m


def _tpu_generation():
    """Best-effort TPU generation sniff: 'v5' / 'v6' / 'v7' / ... or None."""
    try:
        kind = jax.devices()[0].device_kind.lower()
    except Exception:
        return None
    for g in ("v7", "v6", "v5", "v4", "v3", "v2"):
        if g in kind:
            return g
    return None


def _prob_loss_kernel(out_ref, lab_ref, loss_ref, *, use_bf16_math):
    # out_ref : (TILE_N, C)  logits (f32 or bf16), class dim C on the lane axis
    # lab_ref : (1, TILE_N)  i32 class indices, lane-dense
    # loss_ref: (1, TILE_N)  f32 per-sample loss, lane-dense
    tile_n, c = out_ref.shape

    x = out_ref[...]
    if not use_bf16_math:
        x = x.astype(jnp.float32)  # v5e has no bf16 VPU/EUP path

    # labels arrive lane-major; small 32-bit relayout to one label per row.
    lab = lab_ref[...].reshape(tile_n, 1)                        # (TILE_N, 1) i32
    col = jax.lax.broadcasted_iota(jnp.int32, (tile_n, c), 1)    # (TILE_N, C)
    onehot = col == lab                                          # (TILE_N, C)

    # Label-shift softmax (2 lane reduces instead of 3):
    #   x_lab  = x[i, lab[i]]                (masked lane reduce)
    #   denom  = sum_j exp(x_j - x_lab)      (>= 1, includes exp(0)=1 for label)
    #   loss   = -softmax(x)[lab] = -1/denom
    zero = jnp.zeros((), x.dtype)
    x_lab = jnp.sum(jnp.where(onehot, x, zero), axis=-1, keepdims=True)
    e = jnp.exp(x - x_lab)                                       # EUP; bf16 on v6e/v7x
    denom = jnp.sum(e, axis=-1, keepdims=True, dtype=jnp.float32)

    loss = -(1.0 / denom)                                        # exact per-row divide
    loss_ref[...] = loss.reshape(1, tile_n)                      # lane-dense store


def prob_loss_stable(outputs, labels, tile_n=None):
    """outputs: (N, C) float32/bfloat16 logits, labels: (N,) int -> (N,) float32 losses."""
    n, c = outputs.shape
    if outputs.dtype not in (jnp.float32, jnp.bfloat16):
        outputs = outputs.astype(jnp.float32)
    dtype = outputs.dtype
    itemsize = jnp.dtype(dtype).itemsize
    row_align = 16 if dtype == jnp.bfloat16 else 8

    gen = _tpu_generation()
    # bf16 VPU/EUP only exists on v6e/v7x; f32 math elsewhere (and if unknown).
    use_bf16_math = (dtype == jnp.bfloat16) and gen in ("v6", "v7")

    # ---- block sizing: by padded-VMEM bytes, not rows -----------------------
    # Every (tile_n, C) tile occupies full 128-lane vregs/VMEM tiles, so the
    # real footprint scales with C padded to 128 lanes.
    c_pad = _round_up(c, 128)
    # ~4 MiB padded logits block on v5e/v6e (128 MiB VMEM), ~3 MiB on v7x
    # (64 MiB VMEM) and unknown targets.
    target_block_bytes = (4 << 20) if gen in ("v5", "v6") else (3 << 20)

    if tile_n is None:
        rows = max(row_align, target_block_bytes // (c_pad * itemsize))
        tile_n = (rows // row_align) * row_align
    tile_n = max(row_align, (tile_n // row_align) * row_align)
    tile_n = min(tile_n, _round_up(n, row_align))
    # v7x has 2 TensorCores: make sure the ("parallel",) grid has >= 2 steps.
    if gen == "v7" and _round_up(n, row_align) >= 2 * row_align:
        tile_n = min(tile_n, _round_up(pl.cdiv(n, 2), row_align))

    n_pad = _round_up(n, tile_n)
    num_tiles = n_pad // tile_n

    labels = labels.reshape(-1).astype(jnp.int32)
    if n_pad != n:
        outputs = jnp.pad(outputs, ((0, n_pad - n), (0, 0)))
        labels = jnp.pad(labels, (0, n_pad - n))
    labels_ld = labels.reshape(num_tiles, tile_n)  # lane-dense labels

    # ---- explicit VMEM budget (double-buffered logits + full-width temps) ---
    comp_itemsize = 2 if use_bf16_math else 4
    block_in_bytes = tile_n * c_pad * itemsize
    temp_bytes = tile_n * c_pad * (3 * comp_itemsize + 4)   # x, e, masked-x + i32 iota
    aux_bytes = 4 * 8 * tile_n * 4                          # labels/loss blocks, 2 bufs each
    budget = 2 * block_in_bytes + temp_bytes + aux_bytes + (1 << 20)
    vmem_limit = int(min(56 << 20, max(32 << 20, 2 * budget)))

    # TODO(synk): for vocab-sized C add a second "arbitrary" grid axis over C
    # with online-softmax accumulators in VMEM scratch; unnecessary at CIFAR scale.
    kernel = functools.partial(_prob_loss_kernel, use_bf16_math=use_bf16_math)

    loss = pl.pallas_call(
        kernel,
        out_shape=jax.ShapeDtypeStruct((num_tiles, tile_n), jnp.float32),
        grid=(num_tiles,),
        in_specs=[
            pl.BlockSpec((tile_n, c), lambda i: (i, 0)),
            pl.BlockSpec((1, tile_n), lambda i: (i, 0)),
        ],
        out_specs=pl.BlockSpec((1, tile_n), lambda i: (i, 0)),
        compiler_params=pltpu.CompilerParams(
            dimension_semantics=("parallel",),
            vmem_limit_bytes=vmem_limit,
        ),
    )(outputs, labels_ld)

    return loss.reshape(-1)[:n]


def _reference(outputs, labels):
    # pure-JAX reference mirroring torch: -softmax(outputs)[i, labels[i]]
    p = jax.nn.softmax(outputs.astype(jnp.float32), axis=-1)
    return -jnp.take_along_axis(p, labels.astype(jnp.int32)[:, None], axis=-1)[:, 0]


if __name__ == "__main__":
    key = jax.random.PRNGKey(0)
    k_out, k_lab = jax.random.split(key)

    N, C = 64, 10  # CIFAR-10-like: batch of logits over 10 classes
    outputs = jax.random.normal(k_out, (N, C), dtype=jnp.float32)
    labels = jax.random.randint(k_lab, (N,), minval=0, maxval=C, dtype=jnp.int32)

    # f32 path, auto tile
    loss = jax.block_until_ready(prob_loss_stable(outputs, labels))
    ref = _reference(outputs, labels)
    assert loss.shape == (N,)
    assert jnp.allclose(loss, ref, atol=1e-5, rtol=1e-5), (loss, ref)

    # forced multi-tile + row-padding path (N=50 not divisible by tile_n=16)
    loss_mt = jax.block_until_ready(
        prob_loss_stable(outputs[:50], labels[:50], tile_n=16))
    assert loss_mt.shape == (50,)
    assert jnp.allclose(loss_mt, ref[:50], atol=1e-5, rtol=1e-5), (loss_mt, ref[:50])

    # bf16 path: bf16 streaming, bf16 math on v6e/v7x, f32 math on v5e/unknown
    out_bf16 = outputs.astype(jnp.bfloat16)
    loss_bf = jax.block_until_ready(prob_loss_stable(out_bf16, labels))
    ref_bf = _reference(out_bf16, labels)
    assert jnp.allclose(loss_bf, ref_bf, atol=1e-2, rtol=1e-2), (loss_bf, ref_bf)

    print("KERNEL_OK")
</pallas_src>

<mosaic_0001>
module attributes {stable_mosaic.version = 11 : i64} {
  func.func @_prob_loss_kernel(%arg0: i32, %arg1: memref<64x10xf32, #tpu.memory_space<vmem>>, %arg2: memref<1x64xi32, #tpu.memory_space<vmem>>, %arg3: memref<1x64xf32, #tpu.memory_space<vmem>>) attributes {dimension_semantics = [#tpu.dimension_semantics<parallel>], iteration_bounds = array<i64: 1>, scalar_prefetch = 0 : i64, scratch_operands = 0 : i64, tpu.core_type = #tpu.core_type<tc>, window_params = [{transform_indices = @transform_0, window_bounds = array<i64: 64, 10>}, {transform_indices = @transform_1, window_bounds = array<i64: 1, 64>}, {transform_indices = @transform_2, window_bounds = array<i64: 1, 64>}]} {
    %c0 = arith.constant 0 : index
    %c0_0 = arith.constant 0 : index
    %0 = vector.load %arg1[%c0, %c0_0] : memref<64x10xf32, #tpu.memory_space<vmem>>, vector<64x10xf32>
    %c0_1 = arith.constant 0 : index
    %c0_2 = arith.constant 0 : index
    %1 = vector.load %arg2[%c0_1, %c0_2] : memref<1x64xi32, #tpu.memory_space<vmem>>, vector<1x64xi32>
    %2 = vector.shape_cast %1 : vector<1x64xi32> to vector<64x1xi32>
    %3 = tpu.iota {dimensions = array<i32: 1>} : vector<64x10xi32>
    %4 = vector.broadcast %2 : vector<64x1xi32> to vector<64x10xi32>
    %5 = arith.cmpi eq, %3, %4 : vector<64x10xi32>
    %cst = arith.constant 0.000000e+00 : f32
    %6 = vector.broadcast %cst : f32 to vector<64x10xf32>
    %7 = arith.select %5, %0, %6 : vector<64x10xi1>, vector<64x10xf32>
    %cst_3 = arith.constant dense<0.000000e+00> : vector<64xf32>
    %8 = vector.multi_reduction <add>, %7, %cst_3 [1] : vector<64x10xf32> to vector<64xf32>
    %9 = vector.shape_cast %8 : vector<64xf32> to vector<64x1xf32>
    %10 = vector.broadcast %9 : vector<64x1xf32> to vector<64x10xf32>
    %11 = arith.subf %0, %10 : vector<64x10xf32>
    %12 = math.exp %11 : vector<64x10xf32>
    %cst_4 = arith.constant dense<0.000000e+00> : vector<64xf32>
    %13 = vector.multi_reduction <add>, %12, %cst_4 [1] : vector<64x10xf32> to vector<64xf32>
    %14 = vector.shape_cast %13 : vector<64xf32> to vector<64x1xf32>
    %cst_5 = arith.constant 1.000000e+00 : f32
    %15 = vector.broadcast %cst_5 : f32 to vector<64x1xf32>
    %16 = arith.divf %15, %14 : vector<64x1xf32>
    %cst_6 = arith.constant 0.000000e+00 : f32
    %17 = vector.broadcast %cst_6 : f32 to vector<64x1xf32>
    %18 = arith.subf %17, %16 : vector<64x1xf32>
    %19 = vector.shape_cast %18 : vector<64x1xf32> to vector<1x64xf32>
    %c0_7 = arith.constant 0 : index
    %c0_8 = arith.constant 0 : index
    %20 = vector.load %arg3[%c0_7, %c0_8] : memref<1x64xf32, #tpu.memory_space<vmem>>, vector<1x64xf32>
    tpu.vector_store %arg3[%c0_7, %c0_8], %19 {strides = array<i32>} : memref<1x64xf32, #tpu.memory_space<vmem>>, vector<1x64xf32>,
    return
  }
  func.func @transform_0(%arg0: i32) -> (i32, i32) {
    %c0_i32 = arith.constant 0 : i32
    %c0_i32_0 = arith.constant 0 : i32
    return %arg0, %c0_i32 : i32, i32
  }
  func.func @transform_1(%arg0: i32) -> (i32, i32) {
    %c0_i32 = arith.constant 0 : i32
    %c0_i32_0 = arith.constant 0 : i32
    return %arg0, %c0_i32 : i32, i32
  }
  func.func @transform_2(%arg0: i32) -> (i32, i32) {
    %c0_i32 = arith.constant 0 : i32
    %c0_i32_0 = arith.constant 0 : i32
    return %arg0, %c0_i32 : i32, i32
  }
}

</mosaic_0001>

<bundles_post_ra>
// kernel: tpu_custom_call.1
= control target key start
LH: loop header
LB: loop body
LE: loop exit
PB: predicated region body
PF: predicated region fallthrough
CT: control target
= control target key end

     0   :  { %v22_v0 = vlaneseq  ;;  %s612_s0 = inlined_call_operand.vmem [shape: f32[64,10], index: 0, kind: input, shape index: {}]   ;;  %s613_s1 = inlined_call_operand.vmem [shape: s32[1,64], index: 1, kind: input, shape index: {}]   ;;  %s614_s2 = inlined_call_operand.hbm [shape: f32[1,64], index: 2, kind: output, shape index: {}]  }
   0x1   :  { %7 = vsyncpa [#allocation3], 0  ;;  %v355_v4 = vld [vmem:[%s613_s1] ss:$0 sm:$0xff]  ;;  %vm88_vm0 = vcmask 80896   ;;  %v14_v14 = vld [vmem:[%s612_s0 + $0x10] sm:$0xff] }
   0x2   :  { %v23_v1 = vshrl.u32 %v22_v0, 7  ;;  %v433_v11 = vand.u32 127, %v22_v0  ;;  %v12_v12 = vld [vmem:[%s612_s0] sm:$0xff]  ;;  %v454_v25 = vld [vmem:[%s612_s0 + $0x38] sm:$0xff]  ;;  %v13_v27 = vld [vmem:[%s612_s0 + $0x8] sm:$0xff]  ;;  %s336_s29 = sshll.u32 %s614_s2, 4  ;;  %s337_s29 = int_to_ptr.hbm [resolvable:$true] %s336_s29 }
   0x3   :  { %v16_v21 = vld [vmem:[%s612_s0 + $0x20] sm:$0xff]  ;;  %v15_v29 = vld [vmem:[%s612_s0 + $0x18] sm:$0xff]  ;;  %v17_v36 = vld [vmem:[%s612_s0 + $0x28] sm:$0xff] }
   0x4   :  { %346 = vset.pattern.permute.xlu0 %v23_v1  ;;  %v36_v2 = vadd.s32 16, %v23_v1  ;;  %v48_v3 = vadd.s32 32, %v23_v1  ;;  %v30_v5 = vadd.s32 8, %v23_v1  ;;  %v42_v6 = vadd.s32 24, %v23_v1  ;;  %v18_v39 = vld [vmem:[%s612_s0 + $0x30] sm:$0xff]  ;;  %s414_s0 = smov [#allocation2]  }
   0x5   :  { %v54_v7 = vadd.s32 40, %v23_v1  ;;  %v60_v8 = vadd.s32 48, %v23_v1  ;;  %v66_v9 = vadd.s32 56, %v23_v1  ;;  %s334_s26 = sshll.u32 %s414_s0, 4  ;;  %s335_s26 = int_to_ptr.vmem [resolvable:$true] %s334_s26 }
   0x6   :  { %348 = vset.pattern.permute.xlu1 %v36_v2  ;;  %350 = vset.pattern.permute.xlu2 %v48_v3 }
   0xc   :  { %26 = vperm.xlu0 %346, %v355_v4  }
   0xe   :  { %38 = vperm.xlu1 %348, %v355_v4   ;;  %50 = vperm.xlu2 %350, %v355_v4  }
  0x14   :  { %347 = vset.pattern.permute.xlu0 %v30_v5 }
  0x16   :  { %349 = vset.pattern.permute.xlu1 %v42_v6  ;;  %351 = vset.pattern.permute.xlu2 %v54_v7 }
  0x1c   :  { %32 = vperm.xlu0 %347, %v355_v4  }
  0x1e   :  { %44 = vperm.xlu1 %349, %v355_v4   ;;  %56 = vperm.xlu2 %351, %v355_v4  }
  0x24   :  { %354 = vset.pattern.permute.xlu0 %v66_v9 }
  0x26   :  { %352 = vset.pattern.permute.xlu1 %v60_v8  ;;  %353 = vset.pattern.permute.xlu2 %v66_v9 }
  0x2e   :  { %62 = vperm.xlu1 %352, %v355_v4   ;;  %68 = vperm.xlu2 %353, %v355_v4  }
  0x68   :  { %v51_v10 = vpop.permute.xlu2 %50 }
  0x69   :  { %vm76_vm3 = vcmp.eq.s32.totalorder %v433_v11, %v51_v10 }
  0x6a   :  { %v84_v22 = vsel %vm76_vm3, %v16_v21, 0.0 }
  0x6b   :  { %v101_v24 = vsel %vm88_vm0, %v84_v22, 0.0 }
  0x78   :  { %v57_v17 = vpop.permute.xlu2 %56 }
  0x79   :  { %vm77_vm7 = vcmp.eq.s32.totalorder %v433_v11, %v57_v17 }
  0x7a   :  { %v85_v37 = vsel %vm77_vm7, %v17_v36, 0.0  ;;  %vm300_vm7 = vcmask 130112  }
  0x7b   :  { %v104_v38 = vsel %vm88_vm0, %v85_v37, 0.0 }
  0x7e   :  { %v27_v13 = vpop.permute.xlu0 %26 }
  0x7f   :  { %vm72_vm1 = vcmp.eq.s32.totalorder %v433_v11, %v27_v13 }
  0x80   :  { %v39_v15 = vpop.permute.xlu1 %38  ;;  %v80_v16 = vsel %vm72_vm1, %v12_v12, 0.0 }
  0x81   :  { %vm74_vm2 = vcmp.eq.s32.totalorder %v433_v11, %v39_v15  ;;  %v89_v18 = vsel %vm88_vm0, %v80_v16, 0.0 }
  0x82   :  { %90 = vadd.xlane.f32.xlu0 %v89_v18  ;;  %v82_v19 = vsel %vm74_vm2, %v14_v14, 0.0 }
  0x83   :  { %v95_v20 = vsel %vm88_vm0, %v82_v19, 0.0 }
  0x84   :  { %96 = vadd.xlane.f32.xlu2 %v95_v20 }
  0x88   :  { %v69_v23 = vpop.permute.xlu2 %68 }
  0x89   :  { %vm79_vm4 = vcmp.eq.s32.totalorder %v433_v11, %v69_v23 }
  0x8a   :  { %102 = vadd.xlane.f32.xlu0 %v101_v24  ;;  %v87_v26 = vsel %vm79_vm4, %v454_v25, 0.0 }
  0x8b   :  { %v110_v30 = vsel %vm88_vm0, %v87_v26, 0.0 }
  0x8e   :  { %v33_v28 = vpop.permute.xlu0 %32 }
  0x8f   :  { %vm73_vm5 = vcmp.eq.s32.totalorder %v433_v11, %v33_v28 }
  0x90   :  { %v45_v31 = vpop.permute.xlu1 %44  ;;  %v81_v32 = vsel %vm73_vm5, %v13_v27, 0.0 }
  0x91   :  { %vm75_vm6 = vcmp.eq.s32.totalorder %v433_v11, %v45_v31  ;;  %v92_v33 = vsel %vm88_vm0, %v81_v32, 0.0 }
  0x92   :  { %93 = vadd.xlane.f32.xlu1 %v92_v33  ;;  %v83_v34 = vsel %vm75_vm6, %v15_v29, 0.0  ;;  %111 = vadd.xlane.f32.xlu0 %v110_v30 }
  0x93   :  { %v98_v35 = vsel %vm88_vm0, %v83_v34, 0.0 }
  0x94   :  { %99 = vadd.xlane.f32.xlu2 %v98_v35 }
  0x9a   :  { %105 = vadd.xlane.f32.xlu1 %v104_v38 }
  0xa0   :  { %v63_v40 = vpop.permute.xlu1 %62 }
  0xa1   :  { %vm78_vm8 = vcmp.eq.s32.totalorder %v433_v11, %v63_v40 }
  0xa2   :  { %v86_v41 = vsel %vm78_vm8, %v18_v39, 0.0 }
  0xa3   :  { %v107_v42 = vsel %vm88_vm0, %v86_v41, 0.0 }
  0xa4   :  { %108 = vadd.xlane.f32.xlu2 %v107_v42 }
  0xf5   :  { %v91_v43 = vpop.xlane.xlu0 %90 }
  0xf6   :  { %v113_v44 = vsub.f32 %v12_v12, %v91_v43 }
  0xf7   :  { %v97_v45 = vpop.xlane.xlu2 %96 }
  0xf8   :  { %v121_v46 = vmul.f32 1.442695, %v113_v44  ;;  %v115_v47 = vsub.f32 %v14_v14, %v97_v45 }
  0xfa   :  { %356 = vpow2.f32 %v121_v46  ;;  %v125_v48 = vmul.f32 1.442695, %v115_v47 }
  0xfc   :  { %358 = vpow2.f32 %v125_v48  ;;  %v509_v48 = vadd.s32 4294967280, %v433_v11 }
  0xfd   :  { %v103_v52 = vpop.xlane.xlu0 %102 }
  0xfe   :  { %v117_v57 = vsub.f32 %v16_v21, %v103_v52 }
 0x100   :  { %v357_v49 = vpop.eup %356  ;;  %v129_v62 = vmul.f32 1.442695, %v117_v57  ;;  %v521_v57 = vadd.s32 4294967272, %v433_v11 }
 0x101   :  { %v137_v50 = vsel %vm88_vm0, %v357_v49, 0.0 }
 0x102   :  { %v359_v51 = vpop.eup %358  ;;  %138 = vadd.xlane.f32.xlu1 %v137_v50 }
 0x103   :  { %v143_v53 = vsel %vm88_vm0, %v359_v51, 0.0 }
 0x104   :  { %144 = vadd.xlane.f32.xlu0 %v143_v53 }
 0x105   :  { %v94_v54 = vpop.xlane.xlu1 %93  ;;  %v112_v61 = vpop.xlane.xlu0 %111 }
 0x106   :  { %v114_v55 = vsub.f32 %v13_v27, %v94_v54  ;;  %v120_v1 = vsub.f32 %v454_v25, %v112_v61 }
 0x107   :  { %v100_v56 = vpop.xlane.xlu2 %99 }
 0x108   :  { %v123_v58 = vmul.f32 1.442695, %v114_v55  ;;  %v116_v59 = vsub.f32 %v15_v29, %v100_v56  ;;  %v135_v6 = vmul.f32 1.442695, %v120_v1  ;;  %v518_v55 = vadd.s32 4294967288, %v433_v11 }
 0x109   :  { %v533_v1 = vadd.s32 4294967256, %v433_v11 }
 0x10a   :  { %360 = vpow2.f32 %v123_v58  ;;  %v127_v60 = vmul.f32 1.442695, %v116_v59 }
 0x10c   :  { %362 = vpow2.f32 %v127_v60 }
 0x10d   :  { %v106_v63 = vpop.xlane.xlu1 %105  ;;  %364 = vpow2.f32 %v129_v62 }
 0x10e   :  { %v118_v0 = vsub.f32 %v17_v36, %v106_v63 }
 0x110   :  { %v361_v2 = vpop.eup %360  ;;  %v131_v3 = vmul.f32 1.442695, %v118_v0  ;;  %v530_v0 = vadd.s32 4294967264, %v433_v11 }
 0x111   :  { %v140_v4 = vsel %vm88_vm0, %v361_v2, 0.0 }
 0x112   :  { %v363_v5 = vpop.eup %362  ;;  %366 = vpow2.f32 %v131_v3  ;;  %141 = vadd.xlane.f32.xlu2 %v140_v4 }
 0x113   :  { %v146_v7 = vsel %vm88_vm0, %v363_v5, 0.0  ;;  %v365_v8 = vpop.eup %364  ;;  %368 = vpow2.f32 %v135_v6 }
 0x114   :  { %147 = vadd.xlane.f32.xlu1 %v146_v7  ;;  %v149_v14 = vsel %vm88_vm0, %v365_v8, 0.0 }
 0x117   :  { %v109_v9 = vpop.xlane.xlu2 %108 }
 0x118   :  { %v367_v10 = vpop.eup %366  ;;  %v119_v12 = vsub.f32 %v18_v39, %v109_v9 }
 0x119   :  { %v152_v13 = vsel %vm88_vm0, %v367_v10, 0.0  ;;  %v369_v16 = vpop.eup %368 }
 0x11a   :  { %v133_v15 = vmul.f32 1.442695, %v119_v12  ;;  %153 = vadd.xlane.f32.xlu0 %v152_v13  ;;  %150 = vadd.xlane.f32.xlu2 %v149_v14  ;;  %v158_v17 = vsel %vm88_vm0, %v369_v16, 0.0 }
 0x11c   :  { %370 = vpow2.f32 %v133_v15 }
 0x122   :  { %v371_v18 = vpop.eup %370  ;;  %159 = vadd.xlane.f32.xlu2 %v158_v17 }
 0x123   :  { %v155_v19 = vsel %vm88_vm0, %v371_v18, 0.0 }
 0x124   :  { %156 = vadd.xlane.f32.xlu1 %v155_v19 }
 0x175   :  { %v139_v20 = vpop.xlane.xlu1 %138 }
 0x176   :  { %372 = vrcp.f32 %v139_v20  ;;  %v170_v32 = vand.u32 2147483647, %v139_v20  ;;  %v172_v33 = vand.u32 2147483648, %v139_v20  ;;  %vm166_vm10 = vweird.f32 %v139_v20 }
 0x177   :  { %v145_v21 = vpop.xlane.xlu0 %144 }
 0x178   :  { %374 = vrcp.f32 %v145_v21  ;;  %vm171_vm12 = vcmp.eq.f32.partialorder %v170_v32, 8.507059e+37  ;;  %v173_v42 = vor.u32 1.1754944e-38, %v172_v33  ;;  %v202_v44 = vand.u32 2147483648, %v145_v21 }
 0x179   :  { %vm196_vm14 = vweird.f32 %v145_v21  ;;  %v200_v49 = vand.u32 2147483647, %v145_v21 }
 0x17a   :  { %v203_v58 = vor.u32 1.1754944e-38, %v202_v44 }
 0x17b   :  { %vm201_vm2 = vcmp.eq.f32.partialorder %v200_v49, 8.507059e+37 }
 0x17c   :  { %v373_v22 = vpop.eup %372 }
 0x17d   :  { %v162_v23 = vmul.f32 %v373_v22, %v139_v20  ;;  %vm167_vm9 = vweird.f32 %v373_v22 }
 0x17e   :  { %v375_v24 = vpop.eup %374  ;;  %vm490_vm11 = vmor %vm166_vm10, %vm167_vm9 }
 0x17f   :  { %v163_v25 = vsub.f32 1.0, %v162_v23  ;;  %v192_v26 = vmul.f32 %v375_v24, %v145_v21  ;;  %vm197_vm13 = vweird.f32 %v375_v24 }
 0x180   :  { %vm511_vm15 = vmor %vm196_vm14, %vm197_vm13  ;;  %vm304_vm13 = vcmask 195712  }
 0x181   :  { %v164_v27 = vmul.f32 %v373_v22, %v163_v25  ;;  %v193_v29 = vsub.f32 1.0, %v192_v26 }
 0x183   :  { %v165_v31 = vadd.f32 %v373_v22, %v164_v27  ;;  %v194_v34 = vmul.f32 %v375_v24, %v193_v29 }
 0x185   :  { %v142_v28 = vpop.xlane.xlu2 %141  ;;  %v169_v37 = vsel %vm490_vm11, %v373_v22, %v165_v31  ;;  %v195_v43 = vadd.f32 %v375_v24, %v194_v34 }
 0x186   :  { %376 = vrcp.f32 %v142_v28  ;;  %v506_v47 = vsel %vm171_vm12, %v173_v42, %v169_v37  ;;  %v185_v52 = vand.u32 2147483647, %v142_v28  ;;  %v187_v56 = vand.u32 2147483648, %v142_v28 }
 0x187   :  { %v487_v30 = vpop.xlane.xlu1 %147  ;;  %v199_v54 = vsel %vm511_vm15, %v375_v24, %v195_v43  ;;  %vm181_vm1 = vweird.f32 %v142_v28  ;;  %v281_v62 = vsub.f32 0.0, %v506_v47 }
 0x188   :  { %378 = vrcp.f32 %v487_v30  ;;  %v204_v3 = vsel %vm201_vm2, %v203_v58, %v199_v54  ;;  %vm186_vm4 = vcmp.eq.f32.partialorder %v185_v52, 8.507059e+37  ;;  %v188_v7 = vor.u32 1.1754944e-38, %v187_v56 }
 0x189   :  { %v215_v8 = vand.u32 2147483647, %v487_v30  ;;  %vm211_vm5 = vweird.f32 %v487_v30  ;;  %v217_v15 = vand.u32 2147483648, %v487_v30  ;;  %v283_v18 = vsub.f32 0.0, %v204_v3 }
 0x18a   :  { %v297_v36 = vperm.slane %v281_v62, %v433_v11  ;;  %vm308_vm2 = vcmask 261312  }
 0x18b   :  { %vm558_vm10 = vcmp.eq.f32.partialorder %v215_v8, 8.507059e+37 }
 0x18c   :  { %v377_v35 = vpop.eup %376 }
 0x18d   :  { %v177_v38 = vmul.f32 %v377_v35, %v142_v28  ;;  %v496_v39 = vpop.xlane.xlu2 %150  ;;  %v498_v40 = vpop.xlane.xlu0 %153  ;;  %vm182_vm0 = vweird.f32 %v377_v35  ;;  %v218_v28 = vor.u32 1.1754944e-38, %v217_v15 }
 0x18e   :  { %v500_v41 = vpop.eup %378  ;;  %380 = vrcp.f32 %v496_v39  ;;  %vm525_vm3 = vmor %vm181_vm1, %vm182_vm0  ;;  %v232_v16 = vand.u32 2147483648, %v496_v39  ;;  %vm226_vm11 = vweird.f32 %v496_v39  ;;  %v230_v22 = vand.u32 2147483647, %v496_v39 }
 0x18f   :  { %v178_v45 = vsub.f32 1.0, %v177_v38  ;;  %v207_v46 = vmul.f32 %v500_v41, %v487_v30  ;;  %382 = vrcp.f32 %v498_v40  ;;  %vm212_vm6 = vweird.f32 %v500_v41 }
 0x190   :  { %vm554_vm9 = vmor %vm211_vm5, %vm212_vm6  ;;  %v233_v30 = vor.u32 1.1754944e-38, %v232_v16  ;;  %v247_v32 = vand.u32 2147483648, %v498_v40  ;;  %vm241_vm15 = vweird.f32 %v498_v40  ;;  %v245_v34 = vand.u32 2147483647, %v498_v40 }
 0x191   :  { %v179_v51 = vmul.f32 %v377_v35, %v178_v45  ;;  %v208_v53 = vsub.f32 1.0, %v207_v46  ;;  %vm231_vm0 = vcmp.eq.f32.partialorder %v230_v22, 8.507059e+37  ;;  %v303_v45 = vperm.slane %v283_v18, %v509_v48 }
 0x192   :  { %v248_v46 = vor.u32 1.1754944e-38, %v247_v32 }
 0x193   :  { %v180_v59 = vadd.f32 %v377_v35, %v179_v51  ;;  %v209_v60 = vmul.f32 %v500_v41, %v208_v53 }
 0x194   :  { %v381_v61 = vpop.eup %380 }
 0x195   :  { %v535_v2 = vpop.eup %382  ;;  %v184_v4 = vsel %vm525_vm3, %v377_v35, %v180_v59  ;;  %v222_v5 = vmul.f32 %v381_v61, %v496_v39  ;;  %v540_v6 = vpop.xlane.xlu2 %159  ;;  %v210_v10 = vadd.f32 %v500_v41, %v209_v60  ;;  %vm227_vm8 = vweird.f32 %v381_v61 }
 0x196   :  { %v237_v9 = vmul.f32 %v535_v2, %v498_v40  ;;  %384 = vrcp.f32 %v540_v6  ;;  %v189_v14 = vsel %vm186_vm4, %v188_v7, %v184_v4  ;;  %vm242_vm12 = vweird.f32 %v535_v2  ;;  %vm569_vm14 = vmor %vm226_vm11, %vm227_vm8 }
 0x197   :  { %v223_v12 = vsub.f32 1.0, %v222_v5  ;;  %v549_v13 = vpop.xlane.xlu1 %156  ;;  %v282_v24 = vsub.f32 0.0, %v189_v14  ;;  %v214_v25 = vsel %vm554_vm9, %v500_v41, %v210_v10  ;;  %vm585_vm1 = vmor %vm241_vm15, %vm242_vm12  ;;  %v275_v39 = vand.u32 2147483647, %v540_v6 }
 0x198   :  { %v238_v17 = vsub.f32 1.0, %v237_v9  ;;  %386 = vrcp.f32 %v549_v13  ;;  %v219_v37 = vsel %vm558_vm10, %v218_v28, %v214_v25  ;;  %v277_v47 = vand.u32 2147483648, %v540_v6 }
 0x199   :  { %v224_v19 = vmul.f32 %v381_v61, %v223_v12  ;;  %v299_v40 = vperm.slane %v282_v24, %v518_v55  ;;  %v284_v50 = vsub.f32 0.0, %v219_v37  ;;  %vm246_vm3 = vcmp.eq.f32.partialorder %v245_v34, 8.507059e+37 }
 0x19a   :  { %v239_v23 = vmul.f32 %v535_v2, %v238_v17  ;;  %vm271_vm5 = vweird.f32 %v540_v6  ;;  %vm276_vm6 = vcmp.eq.f32.partialorder %v275_v39, 8.507059e+37  ;;  %v262_v56 = vand.u32 2147483648, %v549_v13 }
 0x19b   :  { %v225_v26 = vadd.f32 %v381_v61, %v224_v19  ;;  %v301_v48 = vsel %vm300_vm7, %v299_v40, %v297_v36  ;;  %v278_v58 = vor.u32 1.1754944e-38, %v277_v47  ;;  %v260_v60 = vand.u32 2147483647, %v549_v13 }
 0x19c   :  { %v385_v27 = vpop.eup %384  ;;  %v240_v31 = vadd.f32 %v535_v2, %v239_v23  ;;  %vm256_vm10 = vweird.f32 %v549_v13  ;;  %v305_v5 = vsel %vm304_vm13, %v303_v45, %v301_v48  ;;  %vm312_vm7 = vcmask 326912  }
 0x19d   :  { %v229_v33 = vsel %vm569_vm14, %v381_v61, %v225_v26  ;;  %v267_v35 = vmul.f32 %v385_v27, %v540_v6  ;;  %vm272_vm4 = vweird.f32 %v385_v27  ;;  %v307_v61 = vperm.slane %v284_v50, %v521_v57 }
 0x19e   :  { %v387_v41 = vpop.eup %386  ;;  %v234_v42 = vsel %vm231_vm0, %v233_v30, %v229_v33  ;;  %v244_v43 = vsel %vm585_vm1, %v535_v2, %v240_v31  ;;  %vm273_vm8 = vmor %vm271_vm5, %vm272_vm4  ;;  %v263_v6 = vor.u32 1.1754944e-38, %v262_v56  ;;  %v318_v7 = vadd.s32 4294967248, %v433_v11 }
 0x19f   :  { %v268_v44 = vsub.f32 1.0, %v267_v35  ;;  %v252_v49 = vmul.f32 %v387_v41, %v549_v13  ;;  %v285_v52 = vsub.f32 0.0, %v234_v42  ;;  %v249_v53 = vsel %vm246_vm3, %v248_v46, %v244_v43 }
 0x1a0   :  { %vm257_vm9 = vweird.f32 %v387_v41  ;;  %v286_v62 = vsub.f32 0.0, %v249_v53  ;;  %vm261_vm12 = vcmp.eq.f32.partialorder %v260_v60, 8.507059e+37  ;;  %v322_v9 = vadd.s32 4294967240, %v433_v11 }
 0x1a1   :  { %v269_v51 = vmul.f32 %v385_v27, %v268_v44  ;;  %v253_v54 = vsub.f32 1.0, %v252_v49  ;;  %v311_v2 = vperm.slane %v285_v52, %v530_v0  ;;  %vm258_vm11 = vmor %vm256_vm10, %vm257_vm9  ;;  %v309_v13 = vsel %vm308_vm2, %v307_v61, %v305_v5 }
 0x1a2   :  { %v315_v57 = vperm.slane %v286_v62, %v533_v1  ;;  %vm316_vm14 = vcmask 392512   ;;  %vm320_vm15 = vcmask 458112   ;;  %vm324_vm13 = vcmask 523712  }
 0x1a3   :  { %v270_v55 = vadd.f32 %v385_v27, %v269_v51  ;;  %v254_v59 = vmul.f32 %v387_v41, %v253_v54  ;;  %v313_v14 = vsel %vm312_vm7, %v311_v2, %v309_v13  ;;  %vm327_vm0 = vcmask 516096  }
 0x1a4   :  { %v317_v16 = vsel %vm316_vm14, %v315_v57, %v313_v14 }
 0x1a5   :  { %v274_v63 = vsel %vm273_vm8, %v385_v27, %v270_v55  ;;  %v255_v4 = vadd.f32 %v387_v41, %v254_v59 }
 0x1a6   :  { %v279_v3 = vsel %vm276_vm6, %v278_v58, %v274_v63 }
 0x1a7   :  { %v259_v8 = vsel %vm258_vm11, %v387_v41, %v255_v4  ;;  %v288_v10 = vsub.f32 0.0, %v279_v3 }
 0x1a8   :  { %v264_v12 = vsel %vm261_vm12, %v263_v6, %v259_v8 }
 0x1a9   :  { %v287_v0 = vsub.f32 0.0, %v264_v12  ;;  %v323_v11 = vperm.slane %v288_v10, %v322_v9 }
 0x1ab   :  { %v319_v15 = vperm.slane %v287_v0, %v318_v7 }
 0x1ad   :  { %v321_v1 = vsel %vm320_vm15, %v319_v15, %v317_v16 }
 0x1ae   :  { %v325_v17 = vsel %vm324_vm13, %v323_v11, %v321_v1 }
 0x1af   :  { %328 = vst.msk [vmem:[#allocation2] sm:$0x1] %vm327_vm0, %v325_v17 }
 0x1b0   :  { %339 = dma.vmem_to_hbm [thread:$0]  %s335_s26, 16, %s337_s29, [#allocation3]  }
 0x1b1   :  { %412 = dma.done.wait [#allocation3], 16  }
 0x1b2   :  { %413 = vsyncadd [#allocation3], 4294967280 }
 0x1b3   :  { %344 = vsyncpa [#allocation3], 1 }

</bundles_post_ra>
